<compile_context>
chip_gen: v6e
topology: v6e:2x2x1
jax: 0.10.0
libtpu: 0.0.40
codegen_flags: <defaults>
</compile_context>

<pallas_src>
import functools

import jax
import jax.numpy as jnp
from jax import lax
from jax.experimental import pallas as pl
from jax.experimental.pallas import tpu as pltpu


# ----------------------------------------------------------------------------
# create_pos_encoding (pure JAX setup, matches the torch helper exactly)
# ----------------------------------------------------------------------------
def create_pos_encoding(hidden_size, max_position_embeddings, img_feat_size):
    temperature = 10000.0
    F = img_feat_size
    num_pos_feats = hidden_size // 4
    img_mask = jnp.ones((1, F, F), dtype=jnp.float32)
    y_embed = jnp.cumsum(img_mask, axis=1)
    x_embed = jnp.cumsum(img_mask, axis=2)
    dim_t = jnp.arange(num_pos_feats, dtype=jnp.float32)
    dim_t = temperature ** (2.0 * (dim_t // 2) / num_pos_feats)
    pos_x = x_embed[:, :, :, None] / dim_t
    pos_y = y_embed[:, :, :, None] / dim_t
    pos_x = jnp.stack(
        (jnp.sin(pos_x[:, :, :, 0::2]), jnp.cos(pos_x[:, :, :, 1::2])), axis=4
    ).reshape(1, F, F, -1)
    pos_y = jnp.stack(
        (jnp.sin(pos_y[:, :, :, 0::2]), jnp.cos(pos_y[:, :, :, 1::2])), axis=4
    ).reshape(1, F, F, -1)
    pos_img = jnp.concatenate((pos_y, pos_x), axis=3)            # (1, F, F, H/2)
    pos_img = jnp.transpose(pos_img, (0, 3, 1, 2))               # (1, H/2, F, F)
    pos_img = pos_img.reshape(1, hidden_size // 2, F * F)        # (1, H/2, F*F)
    pad = jnp.zeros(
        (1, hidden_size // 2, max_position_embeddings - F * F), dtype=jnp.float32
    )
    pos_img = jnp.concatenate((pos_img, pad), axis=2)            # (1, H/2, P)
    pos_img = jnp.transpose(pos_img, (0, 2, 1))                  # (1, P, H/2)
    return pos_img


# ----------------------------------------------------------------------------
# Pallas kernel: one-hot MXU embedding gather + bias + LayerNorm
# ----------------------------------------------------------------------------
def _embed_ln_kernel(ids_ref,        # (1, T, 1) int32   token ids for this (s, b) tile
                     table_ref,      # (Vc, H)  f32      word-embedding vocab chunk
                     bias_ref,       # (1, T, H) f32     pos + token_type[0] bias tile
                     gamma_ref,      # (1, H)
                     beta_ref,       # (1, H)
                     o_ref,          # (1, T, H)         output tile
                     acc_ref,        # (T, H) f32        VMEM accumulator
                     *, eps, seq_tile, vocab_tile):
    v = pl.program_id(2)                       # vocab-chunk index (innermost, reduction)

    @pl.when(v == 0)
    def _init():
        # Seed the accumulator with the precomposed additive bias
        # (cat(img_pos, learned_pos) + token_type row 0) — no extra add pass.
        acc_ref[...] = bias_ref[0]

    # One-hot gather on the MXU for this vocab chunk.  Out-of-range ids never
    # match any chunk and simply contribute a zero row (no silent OOB reads).
    ids = ids_ref[0]                                              # (T, 1) int32
    local = ids - v * vocab_tile                                  # (T, 1)
    col = lax.broadcasted_iota(jnp.int32, (seq_tile, vocab_tile), 1)
    onehot = (col == local).astype(jnp.float32)                   # (T, Vc)
    acc_ref[...] += jnp.dot(
        onehot, table_ref[...],
        precision=lax.Precision.HIGHEST,          # exact f32 row selection
        preferred_element_type=jnp.float32)

    @pl.when(v == pl.num_programs(2) - 1)
    def _finalize():
        # LayerNorm over H (two-pass variance, matches the reference module).
        x = acc_ref[...]                                          # (T, H)
        mean = jnp.mean(x, axis=-1, keepdims=True)
        xc = x - mean
        var = jnp.mean(xc * xc, axis=-1, keepdims=True)
        inv = lax.rsqrt(var + eps)                                # EUP slot
        o_ref[0] = xc * inv * gamma_ref[...] + beta_ref[...]


def _pick_tile(total, preferred, align):
    """Largest divisor of `total` that is <= preferred and a multiple of align."""
    if total <= preferred:
        return total
    t = (preferred // align) * align
    while t >= align:
        if total % t == 0:
            return t
        t -= align
    return total


def fused_embed_layernorm(input_ids, table, bias, gamma, beta, *, eps,
                          seq_tile=None, vocab_tile=None):
    """input_ids (B,S) int, table (V,H) f32, bias (1,S,H) f32, gamma/beta (H,)."""
    B, S = input_ids.shape
    V, H = table.shape

    # Sequence tile: largest divisor of S up to 512 rows (>=512-row blocks sit
    # near the HBM roofline; multiples of 8 satisfy the sublane constraint).
    if seq_tile is None:
        seq_tile = _pick_tile(S, 512, 8)
    assert S % seq_tile == 0
    assert seq_tile == S or seq_tile % 8 == 0

    # Vocab chunk: MXU-aligned (multiple of 256 on v6e/v7x); pad the table with
    # zero rows so the chunk count divides evenly.  Padded rows are never
    # selected by valid ids.
    if vocab_tile is None:
        vocab_tile = V if V <= 512 else 512
    v_pad = pl.cdiv(V, vocab_tile) * vocab_tile
    if v_pad != V:
        table = jnp.pad(table, ((0, v_pad - V), (0, 0)))
    n_v = v_pad // vocab_tile
    n_s = S // seq_tile

    # Grid: (seq tiles, batch) parallel, vocab chunks innermost reduction.
    grid = (n_s, B, n_v)

    # Token ids as a regular VMEM input with a trailing unit lane dim so the
    # blocked dims ((seq_tile, 1)) satisfy the (8, 128) rule without SMEM padding.
    ids3 = input_ids.astype(jnp.int32).reshape(B, S, 1)

    # Explicit VMEM budget (double-buffered blocks + scratch + one-hot temp).
    f32b = 4
    est = (2 * vocab_tile * H * f32b        # table chunks
           + 2 * seq_tile * H * f32b        # bias blocks
           + 2 * seq_tile * H * f32b        # output blocks
           + 2 * seq_tile * 128 * f32b      # ids blocks (lane-padded)
           + seq_tile * H * f32b            # accumulator scratch
           + seq_tile * vocab_tile * f32b   # in-kernel one-hot temporary
           + 4 * H * f32b)                  # gamma / beta
    vmem_limit = int(min(64 * 2**20, max(16 * 2**20, 2 * est)))

    kernel = functools.partial(_embed_ln_kernel, eps=eps,
                               seq_tile=seq_tile, vocab_tile=vocab_tile)

    return pl.pallas_call(
        kernel,
        out_shape=jax.ShapeDtypeStruct((B, S, H), jnp.float32),
        grid_spec=pltpu.PrefetchScalarGridSpec(
            num_scalar_prefetch=0,
            grid=grid,
            in_specs=[
                pl.BlockSpec((1, seq_tile, 1), lambda s, b, v: (b, s, 0)),   # ids
                pl.BlockSpec((vocab_tile, H), lambda s, b, v: (v, 0)),       # table chunk
                pl.BlockSpec((1, seq_tile, H), lambda s, b, v: (0, s, 0)),   # bias
                pl.BlockSpec((1, H), lambda s, b, v: (0, 0)),                # gamma
                pl.BlockSpec((1, H), lambda s, b, v: (0, 0)),                # beta
            ],
            out_specs=pl.BlockSpec((1, seq_tile, H), lambda s, b, v: (b, s, 0)),
            scratch_shapes=[pltpu.VMEM((seq_tile, H), jnp.float32)],
        ),
        compiler_params=pltpu.CompilerParams(
            dimension_semantics=("parallel", "parallel", "arbitrary"),
            vmem_limit_bytes=vmem_limit,
        ),
    )(ids3, table, bias, gamma.reshape(1, H), beta.reshape(1, H))


# ----------------------------------------------------------------------------
# Module wrapper (forward pass)
# ----------------------------------------------------------------------------
def my_bert_embeddings_forward(params, input_ids, *, eps):
    """input_ids: (B, S) int32.  Returns (B, S, H) float32.

    Matches MyBertEmbeddings.forward with token_type_ids / position_ids /
    inputs_embeds = None, past_key_values_length = 0, eval mode.
    """
    B, S = input_ids.shape
    H = params["word_embeddings"].shape[1]
    P = params["img_pos_embeddings"].shape[1]
    assert S == P, "forward's concat requires seq_len == max_position_embeddings"

    # Additive bias = cat(img_pos, learned_pos) along hidden + token_type row 0
    # (token_type_ids buffer is all zeros).  (1, S, H) setup glue only — no
    # (B, S, H) intermediates are materialized in HBM.
    pos_half = params["position_embeddings"][:S][None]                         # (1,S,H/2)
    bias = jnp.concatenate((params["img_pos_embeddings"], pos_half), axis=-1)  # (1,S,H)
    bias = bias + params["token_type_embeddings"][0][None, None, :]

    out = fused_embed_layernorm(
        input_ids.astype(jnp.int32),
        params["word_embeddings"],
        bias,
        params["ln_gamma"],
        params["ln_beta"],
        eps=eps,
    )
    # TODO(synk): nn.Dropout omitted (identity in eval mode).
    return out


# ----------------------------------------------------------------------------
# Pure-JAX reference for verification (faithful to the torch module)
# ----------------------------------------------------------------------------
def reference_forward(params, input_ids, *, eps):
    B, S = input_ids.shape
    inputs_embeds = jnp.take(params["word_embeddings"], input_ids, axis=0)
    tok_type_emb = jnp.take(params["token_type_embeddings"],
                            jnp.zeros((B, S), jnp.int32), axis=0)
    pos_half = jnp.take(params["position_embeddings"],
                        jnp.arange(S, dtype=jnp.int32), axis=0)[None]
    pos_emb = jnp.concatenate((params["img_pos_embeddings"], pos_half), axis=-1)
    x = inputs_embeds + tok_type_emb + pos_emb
    mean = jnp.mean(x, axis=-1, keepdims=True)
    var = jnp.mean((x - mean) ** 2, axis=-1, keepdims=True)
    xn = (x - mean) / jnp.sqrt(var + eps)
    return xn * params["ln_gamma"] + params["ln_beta"]


# ----------------------------------------------------------------------------
# Main
# ----------------------------------------------------------------------------
if __name__ == "__main__":
    # Small config consistent with the module.
    vocab_size = 32
    hidden_size = 32                 # H (must be divisible by 4)
    type_vocab_size = 2              # args.progressive = False
    pad_token_id = 0
    layer_norm_eps = 1e-12
    img_feat_size = 4                # F -> F*F = 16 image positions
    max_position_embeddings = 16     # P
    batch = 2
    seq_len = 16                     # cat in forward requires S == P

    key = jax.random.PRNGKey(0)
    k_word, k_pos, k_tok, k_ids = jax.random.split(key, 4)

    word_embeddings = 0.02 * jax.random.normal(
        k_word, (vocab_size, hidden_size), dtype=jnp.float32)
    # nn.Embedding padding_idx row is zero-initialized.
    word_embeddings = word_embeddings.at[pad_token_id].set(0.0)

    position_embeddings = 0.02 * jax.random.normal(
        k_pos, (max_position_embeddings, hidden_size // 2), dtype=jnp.float32)
    token_type_embeddings = 0.02 * jax.random.normal(
        k_tok, (type_vocab_size, hidden_size), dtype=jnp.float32)

    params = {
        "word_embeddings": word_embeddings,
        "position_embeddings": position_embeddings,
        "token_type_embeddings": token_type_embeddings,
        "img_pos_embeddings": create_pos_encoding(
            hidden_size, max_position_embeddings, img_feat_size),   # (1, P, H/2)
        "ln_gamma": jnp.ones((hidden_size,), jnp.float32),
        "ln_beta": jnp.zeros((hidden_size,), jnp.float32),
    }

    input_ids = jax.random.randint(k_ids, (batch, seq_len), 0, vocab_size,
                                   dtype=jnp.int32)

    out = my_bert_embeddings_forward(params, input_ids, eps=layer_norm_eps)
    out = jax.block_until_ready(out)

    ref = reference_forward(params, input_ids, eps=layer_norm_eps)
    assert out.shape == (batch, seq_len, hidden_size)
    assert jnp.allclose(out, ref, atol=1e-5, rtol=1e-5), "mismatch vs reference"

    print("KERNEL_OK")
</pallas_src>

<mosaic_0001>
module attributes {stable_mosaic.version = 11 : i64} {
  func.func @_embed_ln_kernel(%arg0: i32, %arg1: i32, %arg2: i32, %arg3: memref<1x16x1xi32, #tpu.memory_space<vmem>>, %arg4: memref<32x32xf32, #tpu.memory_space<vmem>>, %arg5: memref<1x16x32xf32, #tpu.memory_space<vmem>>, %arg6: memref<1x32xf32, #tpu.memory_space<vmem>>, %arg7: memref<1x32xf32, #tpu.memory_space<vmem>>, %arg8: memref<1x16x32xf32, #tpu.memory_space<vmem>>, %arg9: memref<16x32xf32, #tpu.memory_space<vmem>>) attributes {dimension_semantics = [#tpu.dimension_semantics<parallel>, #tpu.dimension_semantics<parallel>, #tpu.dimension_semantics<arbitrary>], iteration_bounds = array<i64: 1, 2, 1>, scalar_prefetch = 0 : i64, scratch_operands = 1 : i64, tpu.core_type = #tpu.core_type<tc>, window_params = [{transform_indices = @transform_0, window_bounds = array<i64: 1, 16, 1>}, {transform_indices = @transform_1, window_bounds = array<i64: 32, 32>}, {transform_indices = @transform_2, window_bounds = array<i64: 1, 16, 32>}, {pipeline_mode = #tpu.pipeline_mode<synchronous>, transform_indices = @transform_3, window_bounds = array<i64: 1, 32>}, {pipeline_mode = #tpu.pipeline_mode<synchronous>, transform_indices = @transform_4, window_bounds = array<i64: 1, 32>}, {transform_indices = @transform_5, window_bounds = array<i64: 1, 16, 32>}]} {
    %c0_i32 = arith.constant 0 : i32
    %0 = arith.cmpi eq, %arg2, %c0_i32 : i32
    %1 = arith.extui %0 : i1 to i32
    %c0_i32_0 = arith.constant 0 : i32
    %2 = arith.cmpi ne, %1, %c0_i32_0 : i32
    scf.if %2 {
      %c0_11 = arith.constant 0 : index
      %c0_12 = arith.constant 0 : index
      %c0_13 = arith.constant 0 : index
      %21 = vector.load %arg5[%c0_11, %c0_12, %c0_13] : memref<1x16x32xf32, #tpu.memory_space<vmem>>, vector<1x16x32xf32>
      %22 = vector.shape_cast %21 : vector<1x16x32xf32> to vector<16x32xf32>
      %c0_14 = arith.constant 0 : index
      %c0_15 = arith.constant 0 : index
      %23 = vector.load %arg9[%c0_14, %c0_15] : memref<16x32xf32, #tpu.memory_space<vmem>>, vector<16x32xf32>
      tpu.vector_store %arg9[%c0_14, %c0_15], %22 {strides = array<i32>} : memref<16x32xf32, #tpu.memory_space<vmem>>, vector<16x32xf32>,
    } else {
    }
    %c0 = arith.constant 0 : index
    %c0_1 = arith.constant 0 : index
    %c0_2 = arith.constant 0 : index
    %3 = vector.load %arg3[%c0, %c0_1, %c0_2] : memref<1x16x1xi32, #tpu.memory_space<vmem>>, vector<1x16x1xi32>
    %4 = vector.shape_cast %3 : vector<1x16x1xi32> to vector<16x1xi32>
    %c32_i32 = arith.constant 32 : i32
    %5 = arith.muli %arg2, %c32_i32 : i32
    %6 = vector.broadcast %5 : i32 to vector<16x1xi32>
    %7 = arith.subi %4, %6 : vector<16x1xi32>
    %8 = tpu.iota {dimensions = array<i32: 1>} : vector<16x32xi32>
    %9 = vector.broadcast %7 : vector<16x1xi32> to vector<16x32xi32>
    %10 = arith.cmpi eq, %8, %9 : vector<16x32xi32>
    %11 = arith.extui %10 : vector<16x32xi1> to vector<16x32xi32>
    %12 = arith.sitofp %11 : vector<16x32xi32> to vector<16x32xf32>
    %c0_3 = arith.constant 0 : index
    %c0_4 = arith.constant 0 : index
    %13 = vector.load %arg9[%c0_3, %c0_4] : memref<16x32xf32, #tpu.memory_space<vmem>>, vector<16x32xf32>
    %c0_5 = arith.constant 0 : index
    %c0_6 = arith.constant 0 : index
    %14 = vector.load %arg4[%c0_5, %c0_6] : memref<32x32xf32, #tpu.memory_space<vmem>>, vector<32x32xf32>
    %cst = arith.constant dense<0.000000e+00> : vector<16x32xf32>
    %15 = tpu.matmul %12, %14, %cst {dimension_numbers = #tpu.dot_dimension_numbers<[1], [0], [0], [1], [0, 0, 1, 1], [], []>, precision = #tpu.contract_precision<fp32>} : vector<16x32xf32>, vector<32x32xf32>, vector<16x32xf32> -> vector<16x32xf32>
    %16 = arith.addf %13, %15 : vector<16x32xf32>
    %c0_7 = arith.constant 0 : index
    %c0_8 = arith.constant 0 : index
    %17 = vector.load %arg9[%c0_7, %c0_8] : memref<16x32xf32, #tpu.memory_space<vmem>>, vector<16x32xf32>
    tpu.vector_store %arg9[%c0_7, %c0_8], %16 {strides = array<i32>} : memref<16x32xf32, #tpu.memory_space<vmem>>, vector<16x32xf32>,
    %c0_i32_9 = arith.constant 0 : i32
    %18 = arith.cmpi eq, %arg2, %c0_i32_9 : i32
    %19 = arith.extui %18 : i1 to i32
    %c0_i32_10 = arith.constant 0 : i32
    %20 = arith.cmpi ne, %19, %c0_i32_10 : i32
    scf.if %20 {
      %c0_11 = arith.constant 0 : index
      %c0_12 = arith.constant 0 : index
      %21 = vector.load %arg9[%c0_11, %c0_12] : memref<16x32xf32, #tpu.memory_space<vmem>>, vector<16x32xf32>
      %cst_13 = arith.constant dense<0.000000e+00> : vector<16xf32>
      %22 = vector.multi_reduction <add>, %21, %cst_13 [1] : vector<16x32xf32> to vector<16xf32>
      %23 = vector.shape_cast %22 : vector<16xf32> to vector<16x1xf32>
      %cst_14 = arith.constant 3.200000e+01 : f32
      %24 = vector.broadcast %cst_14 : f32 to vector<16x1xf32>
      %25 = arith.divf %23, %24 : vector<16x1xf32>
      %26 = vector.broadcast %25 : vector<16x1xf32> to vector<16x32xf32>
      %27 = arith.subf %21, %26 : vector<16x32xf32>
      %28 = arith.mulf %27, %27 : vector<16x32xf32>
      %cst_15 = arith.constant dense<0.000000e+00> : vector<16xf32>
      %29 = vector.multi_reduction <add>, %28, %cst_15 [1] : vector<16x32xf32> to vector<16xf32>
      %30 = vector.shape_cast %29 : vector<16xf32> to vector<16x1xf32>
      %cst_16 = arith.constant 3.200000e+01 : f32
      %31 = vector.broadcast %cst_16 : f32 to vector<16x1xf32>
      %32 = arith.divf %30, %31 : vector<16x1xf32>
      %cst_17 = arith.constant 9.99999996E-13 : f32
      %33 = vector.broadcast %cst_17 : f32 to vector<16x1xf32>
      %34 = arith.addf %32, %33 : vector<16x1xf32>
      %35 = math.rsqrt %34 : vector<16x1xf32>
      %36 = vector.broadcast %35 : vector<16x1xf32> to vector<16x32xf32>
      %37 = arith.mulf %27, %36 : vector<16x32xf32>
      %c0_18 = arith.constant 0 : index
      %c0_19 = arith.constant 0 : index
      %38 = vector.load %arg6[%c0_18, %c0_19] : memref<1x32xf32, #tpu.memory_space<vmem>>, vector<1x32xf32>
      %39 = vector.broadcast %38 : vector<1x32xf32> to vector<16x32xf32>
      %40 = arith.mulf %37, %39 : vector<16x32xf32>
      %c0_20 = arith.constant 0 : index
      %c0_21 = arith.constant 0 : index
      %41 = vector.load %arg7[%c0_20, %c0_21] : memref<1x32xf32, #tpu.memory_space<vmem>>, vector<1x32xf32>
      %42 = vector.broadcast %41 : vector<1x32xf32> to vector<16x32xf32>
      %43 = arith.addf %40, %42 : vector<16x32xf32>
      %c0_22 = arith.constant 0 : index
      %c0_23 = arith.constant 0 : index
      %c0_24 = arith.constant 0 : index
      %44 = vector.load %arg8[%c0_22, %c0_23, %c0_24] : memref<1x16x32xf32, #tpu.memory_space<vmem>>, vector<1x16x32xf32>
      %45 = vector.shape_cast %44 : vector<1x16x32xf32> to vector<16x32xf32>
      %46 = vector.shape_cast %43 : vector<16x32xf32> to vector<1x16x32xf32>
      tpu.vector_store %arg8[%c0_22, %c0_23, %c0_24], %46 {strides = array<i32>} : memref<1x16x32xf32, #tpu.memory_space<vmem>>, vector<1x16x32xf32>,
    } else {
    }
    return
  }
  func.func @transform_0(%arg0: i32, %arg1: i32, %arg2: i32) -> (i32, i32, i32) {
    %c0_i32 = arith.constant 0 : i32
    %c0_i32_0 = arith.constant 0 : i32
    return %arg1, %arg0, %c0_i32 : i32, i32, i32
  }
  func.func @transform_1(%arg0: i32, %arg1: i32, %arg2: i32) -> (i32, i32) {
    %c0_i32 = arith.constant 0 : i32
    %c0_i32_0 = arith.constant 0 : i32
    return %arg2, %c0_i32 : i32, i32
  }
  func.func @transform_2(%arg0: i32, %arg1: i32, %arg2: i32) -> (i32, i32, i32) {
    %c0_i32 = arith.constant 0 : i32
    %c0_i32_0 = arith.constant 0 : i32
    %c0_i32_1 = arith.constant 0 : i32
    return %c0_i32, %arg0, %c0_i32_0 : i32, i32, i32
  }
  func.func @transform_3(%arg0: i32, %arg1: i32, %arg2: i32) -> (i32, i32) {
    %c0_i32 = arith.constant 0 : i32
    %c0_i32_0 = arith.constant 0 : i32
    %c0_i32_1 = arith.constant 0 : i32
    return %c0_i32, %c0_i32_0 : i32, i32
  }
  func.func @transform_4(%arg0: i32, %arg1: i32, %arg2: i32) -> (i32, i32) {
    %c0_i32 = arith.constant 0 : i32
    %c0_i32_0 = arith.constant 0 : i32
    %c0_i32_1 = arith.constant 0 : i32
    return %c0_i32, %c0_i32_0 : i32, i32
  }
  func.func @transform_5(%arg0: i32, %arg1: i32, %arg2: i32) -> (i32, i32, i32) {
    %c0_i32 = arith.constant 0 : i32
    %c0_i32_0 = arith.constant 0 : i32
    return %arg1, %arg0, %c0_i32 : i32, i32, i32
  }
}

</mosaic_0001>

<bundles_post_ra>
// kernel: tpu_custom_call.1
= control target key start
LH: loop header
LB: loop body
LE: loop exit
PB: predicated region body
PF: predicated region fallthrough
CT: control target
= control target key end

     0   :  { %10 = vsyncpa [#allocation4], 0  ;;  %s1664_s0 = inlined_call_operand.vmem [shape: s32[2,16,1], index: 0, kind: input, shape index: {}]   ;;  %s1665_s1 = inlined_call_operand.vmem [shape: f32[32,32], index: 1, kind: input, shape index: {}]   ;;  %s1666_s2 = inlined_call_operand.hbm [shape: f32[1,16,32], index: 2, kind: input, shape index: {}]   ;;  %s1667_s3 = inlined_call_operand.vmem [shape: f32[1,32], index: 3, kind: input, shape index: {}]   ;;  %s1668_s4 = inlined_call_operand.vmem [shape: f32[1,32], index: 4, kind: input, shape index: {}]   ;;  %s1669_s5 = inlined_call_operand.hbm [shape: f32[2,16,32], index: 5, kind: output, shape index: {}]  }
   0x1   :  { %11 = vsyncpa [#allocation5], 0 }
   0x2   :  { %13 = vsyncpa [#allocation5 + $0x1], 0  ;;  %s1413_s18 = smov 0   ;;  %s1415_s19 = smov 0  }
   0x3   :  { %s1417_s20 = smov 0   ;;  %s1419_s21 = smov 0  }
   0x4   :  { %s1421_s22 = smov 0   ;;  %s1423_s23 = smov 0  }
   0x5 LB: > { %s1060_s24 = sadd.s32 4294967295, %s1373_s23   ;;  %s1061_s25 = sadd.s32 4294967294, %s1373_s23   ;;  %s1373_s23 = sphi %s1423_s23, %s19_s23   ;;  %s1369_s22 = sphi %s1421_s22, %s1678_s22   ;;  %s1365_s21 = sphi %s1419_s21, %s1677_s21   ;;  %s1361_s20 = sphi %s1417_s20, %s1676_s20   ;;  %s1357_s19 = sphi %s1415_s19, %s1675_s19   ;;  %s1353_s18 = sphi %s1413_s18, %s1674_s18  }
   0x6   : > { %s34_s26 = sadd.s32 1, %s1369_s22  ;;  %s169_s27 = sadd.s32 1, %s1361_s20 }
   0x7   : > { %p36_p0 = scmp.ge.s32.totalorder %s34_s26, 2  ;;  %p179_p1 = scmp.ne.s32.totalorder %s1361_s20, %s1357_s19 }
   0x8   : > { %p180_p2 = scmp.eq.s32.totalorder %s1060_s24, 1  ;;  %p185_p3 = scmp.ne.s32.totalorder %s1357_s19, %s1353_s18 }
   0x9   : > { %s1680_s26 = smov (%p36_p0, %s34_s26), 0  ;;  %p186_p5 = scmp.eq.s32.totalorder %s1061_s25, 1 }
   0xa   : > { %p1453_p4 = por %p180_p2, %p179_p1  ;;  %s164_s29 = ssub.s32 %s1369_s22, %s1680_s26 }
   0xb   : > { %p1062_p6 = scmp.ge.s32.totalorder %s1373_s23, 1  ;;  %p167_p7 = scmp.eq.s32.totalorder %s164_s29, 0 }
   0xc   : > { %p1460_p8 = por %p186_p5, %p185_p3  ;;  %p193_p9 = scmp.lt.s32.totalorder %s1373_s23, 3 }
   0xd   : > { %s1466_s6 = scalar_select %p167_p7, %s1361_s20, %s169_s27  }
   0xe   : > { %p1468_p10 = pnand %p1062_p6, %p193_p9  ;;  %p1472_p11 = scmp.eq.s32.totalorder %s1060_s24, 0 }
   0xf   : > { %s1375_s9 = smov [#allocation3]  }
  0x10   : > { %p1196_p12 = pneg %p1468_p10  ;;  %s217_s10 = sshll.u32 %s1375_s9, 4  ;;  %s218_s10 = int_to_ptr.vmem [resolvable:$true] %s217_s10 }
  0x11   : > { %s1278_s11 = scalar_lea.vmem %s218_s10, 256  ;;  %p1286_p5 = scmp.lt.s32.totalorder %s218_s10, %s218_s10 }
  0x12   : > { %p1197_p13 = pnand %p1472_p11, %p1196_p12  ;;  %p1279_p1 = scmp.ne.s32.totalorder %s218_s10, %s1278_s11 }
  0x13   : > { %p1287_p6 = scmp.lt.s32.totalorder %s1278_s11, %s1278_s11 }
  0x14   : > { %p1269_p0 = pneg %p1197_p13 }
  0x15   : > { %p1288_p7 = por %p1287_p6, %p1286_p5 }
  0x16   : > { %p1281_p2 = pnand %p1279_p1, %p1269_p0 }
  0x18   : > { %p1282_p3 = pneg %p1281_p2 }
  0x1a   : > { %p1289_p9 = pnand %p1288_p7, %p1282_p3 }
  0x1c   : > { %1292 = shalt.err (!%p1289_p9)
}
  0x1d   : > { %s1376_s12 = smov 128   ;;  %s1377_s13 = smov 8  }
  0x1e   : > { %1199 = dma.hbm_to_vmem [thread:$0]  (!%p1197_p13), %s1666_s2, 256, %s218_s10, [#allocation4], %s1376_s12, %s1376_s12, %s1377_s13  }
  0x1f   : > { %252 = sbr.rel (%p1468_p10) target bundleno = 735 (0x2df), region = 40 }
  0x24   : > { %1344 = dma.done.wait (%p1472_p11), [#allocation4], 256  }
  0x25   : > { %1346 = vsyncadd (%p1472_p11), [#allocation4], 4294967040  ;;  %p290_p12 = scmp.lt.s32.totalorder %s1365_s21, 1  ;;  %v1378_v0 = vmov 0   ;;  %v341_v2 = vld [vmem:[%s1665_s1 + $0x18] sm:$0xff]  ;;  %v340_v4 = vld [vmem:[%s1665_s1 + $0x10] sm:$0xff]  ;;  %v322_v27 = vlaneseq }
  0x26   : > { %1262 = vset.pattern.permute.xlu0 %v1378_v0  ;;  %v1497_v3 = vand.u32 4294901760, %v341_v2  ;;  %v339_v5 = vld [vmem:[%s1665_s1 + $0x8] sm:$0xff]  ;;  %v338_v6 = vld [vmem:[%s1665_s1] sm:$0xff]  ;;  %v1508_v8 = vand.u32 4294901760, %v340_v4  ;;  %vm313_vm0 = vcmask 261120   ;;  %v1379_v30 = vmov 0.0  }
  0x27   : > { %s291_s16 = scalar_select %p290_p12, %s1365_s21, 1  ;;  %v1510_v9 = vand.u32 4294901760, %v339_v5  ;;  %v1512_v10 = vand.u32 4294901760, %v338_v6  ;;  %v323_v28 = vand.u32 127, %v322_v27  ;;  %v312_v44 = vld [vmem:[#allocation3 + $0x8] sm:$0xff]  ;;  %v311_v45 = vld [vmem:[#allocation3] sm:$0xff] }
  0x28   : > { %v1515_v11 = vsub.f32 %v341_v2, %v1497_v3  ;;  %1124 = vmatprep.subr.mxu0 %v1497_v3  ;;  %v1519_v12 = vsub.f32 %v340_v4, %v1508_v8  ;;  %315 = vst.msk [vmem:[#allocation2 + $0x8] sm:$0xff] %vm313_vm0, %v312_v44  ;;  %314 = vst.msk [vmem:[#allocation2] sm:$0xff] %vm313_vm0, %v311_v45  ;;  %s286_s14 = sand.u32 1, %s1357_s19   ;;  %s1380_s12 = smov [#allocation6]  }
  0x29   : > { %s1086_s17 = sshll.u32 %s291_s16, 4  ;;  %v1522_v13 = vsub.f32 %v339_v5, %v1510_v9  ;;  %v1525_v14 = vsub.f32 %v338_v6, %v1512_v10  ;;  %1125 = vmatpush3.msra.mxu0 %v1497_v3  ;;  %s1619_s11 = scalar_lea.sflag [#allocation5], %s286_s14 }
  0x2a   : > { %s297_s27 = scalar_lea.vmem %s1664_s0, %s1086_s17  ;;  %v1529_v15 = vand.u32 4294901760, %v1515_v11  ;;  %1126 = vmatprep.subr.mxu0 %v1508_v8  ;;  %v1533_v16 = vand.u32 4294901760, %v1519_v12  ;;  %s1068_s17 = sshll.u32 %s286_s14, 4 }
  0x2b   : > { %v316_v1 = vld [vmem:[%s297_s27] sm:$0xff]  ;;  %v317_v7 = vld [vmem:[%s297_s27 + $0x8] sm:$0xff]  ;;  %v1536_v17 = vand.u32 4294901760, %v1522_v13  ;;  %v1539_v18 = vand.u32 4294901760, %v1525_v14  ;;  %1127 = vmatpush3.msra.mxu0 %v1508_v8  ;;  %s1087_s27 = sshll.u32 %s1365_s21, 8  ;;  %s288_s29 = scalar_lea.vmem [#allocation6], %s1068_s17 }
  0x2c   : > { %325 = vperm.xlu0 %1262, %v316_v1   ;;  %v466_v19 = vsub.f32 %v1515_v11, %v1529_v15  ;;  %1128 = vmatprep.subr.mxu0 %v1510_v9  ;;  %v473_v20 = vsub.f32 %v1519_v12, %v1533_v16  ;;  %s949_s7 = sshll.u32 %s288_s29, 4  ;;  %s1614_s10 = scalar_lea.hbm %s1669_s5, %s1087_s27  ;;  %s1616_s7 = int_to_ptr.vmem [resolvable:$true] %s949_s7 }
  0x2d   : > { %v480_v21 = vsub.f32 %v1522_v13, %v1536_v17  ;;  %1129 = vmatpush3.msra.mxu0 %v1510_v9  ;;  %v487_v23 = vsub.f32 %v1525_v14, %v1539_v18  ;;  %s1293_s21 = scalar_lea.vmem %s1616_s7, 256  ;;  %s1297_s13 = sshll.u32 %s1380_s12, 4  ;;  %s1298_s13 = int_to_ptr.vmem [resolvable:$false] %s1297_s13 }
  0x2e   : > { %v467_v22 = vand.u32 4294901760, %v466_v19  ;;  %1130 = vmatprep.subr.mxu0 %v1512_v10  ;;  %v474_v24 = vand.u32 4294901760, %v473_v20  ;;  %p1294_p10 = scmp.ne.s32.totalorder %s1616_s7, %s1293_s21  ;;  %s1299_s15 = scalar_lea.vmem %s1298_s13, 512 }
  0x2f   : > { %1131 = vmatpush3.msra.mxu0 %v1512_v10  ;;  %v481_v25 = vand.u32 4294901760, %v480_v21  ;;  %v488_v26 = vand.u32 4294901760, %v487_v23  ;;  %v337_v63 = vld [vmem:[#allocation2 + $0x8] sm:$0xff]  ;;  %v336_v4 = vld [vmem:[#allocation2] sm:$0xff]  ;;  %p1300_p0 = scmp.lt.s32.totalorder %s1616_s7, %s1298_s13  ;;  %p1301_p1 = scmp.lt.s32.totalorder %s1299_s15, %s1293_s21 }
  0x30   : > { %328 = vperm.xlu0 %1262, %v317_v7   ;;  %1135 = vmatprep.subr.mxu1 %v467_v22  ;;  %p1295_p11 = pnand %p1294_p10, %p1453_p4 }
  0x31   : > { %1146 = vmatprep.subr.mxu0 %v1515_v11  ;;  %1136 = vmatpush3.msra.mxu1 %v467_v22  ;;  %p1302_p2 = por %p1301_p1, %p1300_p0 }
  0x32   : > { %1137 = vmatprep.subr.mxu1 %v474_v24  ;;  %p1296_p13 = pneg %p1295_p11 }
  0x33   : > { %1138 = vmatpush3.msra.mxu1 %v474_v24 }
  0x34   : > { %1139 = vmatprep.subr.mxu1 %v481_v25  ;;  %p1303_p3 = pnand %p1302_p2, %p1296_p13 }
  0x35   : > { %1140 = vmatpush3.msra.mxu1 %v481_v25 }
  0x36   : > { %1141 = vmatprep.subr.mxu1 %v488_v26 }
  0x37   : > { %1142 = vmatpush3.msra.mxu1 %v488_v26 }
  0x38   : > { %1157 = vmatprep.subr.mxu1 %v1497_v3 }
  0xa7   : > { %v326_v29 = vpop.permute.xlu0 %325 }
  0xa8   : > { %vm330_vm1 = vcmp.eq.s32.totalorder %v323_v28, %v326_v29  ;;  %v1079_v29 = vld [vmem:[%s1667_s3] ss:$0 sm:$0xff] }
  0xa9   : > { %v1071_v31 = vsel %vm330_vm1, 1.0, %v1379_v30 }
  0xaa   : > { %v344_v32 = vsel %vm313_vm0, %v1071_v31, 0  ;;  %1143 = vmatprep.mubr.msk.f32.mxu1 %vm313_vm0, %v1071_v31 }
  0xab   : > { %v419_v33 = vsub.f32 %v344_v32, %v344_v32  ;;  %v329_v34 = vpop.permute.xlu0 %328 }
  0xac   : > { %vm331_vm2 = vcmp.eq.s32.totalorder %v323_v28, %v329_v34 }
  0xad   : > { %v1072_v35 = vsel %vm331_vm2, 1.0, %v1379_v30  ;;  %v420_v36 = vand.u32 4294901760, %v419_v33 }
  0xae   : > { %v347_v37 = vsel %vm313_vm0, %v1072_v35, 0  ;;  %1144 = vmatmul.mubr.msk.f32.vlgmr.msra.gmra.mxu1 %vm313_vm0, %v1072_v35 }
  0xaf   : > { %v429_v38 = vsub.f32 %v347_v37, %v347_v37  ;;  %1158 = vmatpush3.msra.mxu1 %v1497_v3  ;;  %1165 = vmatprep.mubr.f32.mxu1 %v420_v36  ;;  %v421_v39 = vsub.f32 %v419_v33, %v420_v36 }
  0xb0   : > { %1159 = vmatprep.subr.mxu1 %v1508_v8 }
  0xb1   : > { %1160 = vmatpush3.msra.mxu1 %v1508_v8  ;;  %v422_v40 = vand.u32 4294901760, %v421_v39  ;;  %v430_v41 = vand.u32 4294901760, %v429_v38 }
  0xb2   : > { %1161 = vmatprep.subr.mxu1 %v1510_v9 }
  0xb3   : > { %1162 = vmatpush3.msra.mxu1 %v1510_v9  ;;  %1132 = vmatprep.mubr.f32.mxu0 %v422_v40  ;;  %v431_v42 = vsub.f32 %v429_v38, %v430_v41 }
  0xb4   : > { %1163 = vmatprep.subr.mxu1 %v1512_v10 }
  0xb5   : > { %1164 = vmatpush3.msra.mxu1 %v1512_v10  ;;  %v432_v43 = vand.u32 4294901760, %v431_v42 }
  0xb6   : > { %1166 = vmatmul.mubr.f32.vlgmr.msra.gmra.mxu1 %v430_v41  ;;  %1179 = vmatprep.subr.mxu1 %v1497_v3 }
  0xb7   : > { %1180 = vmatpush3.msra.mxu1 %v1497_v3  ;;  %1187 = vmatprep.mubr.msk.f32.mxu1 %vm313_vm0, %v1071_v31 }
  0xb8   : > { %1133 = vmatmul.mubr.f32.vlgmr.msra.gmra.mxu0 %v432_v43  ;;  %1181 = vmatprep.subr.mxu1 %v1508_v8 }
  0xb9   : > { %1147 = vmatpush3.msra.mxu0 %v1515_v11  ;;  %1154 = vmatprep.mubr.f32.mxu0 %v419_v33 }
  0xba   : > { %1148 = vmatprep.subr.mxu0 %v1519_v12  ;;  %1182 = vmatpush3.msra.mxu1 %v1508_v8 }
  0xbb   : > { %1149 = vmatpush3.msra.mxu0 %v1519_v12  ;;  %1183 = vmatprep.subr.mxu1 %v1510_v9 }
  0xbc   : > { %1150 = vmatprep.subr.mxu0 %v1522_v13  ;;  %1184 = vmatpush3.msra.mxu1 %v1510_v9 }
  0xbd   : > { %1151 = vmatpush3.msra.mxu0 %v1522_v13  ;;  %1185 = vmatprep.subr.mxu1 %v1512_v10 }
  0xbe   : > { %1152 = vmatprep.subr.mxu0 %v1525_v14  ;;  %1186 = vmatpush3.msra.mxu1 %v1512_v10 }
  0xbf   : > { %1153 = vmatpush3.msra.mxu0 %v1525_v14  ;;  %1188 = vmatmul.mubr.msk.f32.vlgmr.msra.gmra.mxu1 %vm313_vm0, %v1072_v35 }
  0xc0   : > { %1155 = vmatmul.mubr.f32.vlgmr.msra.gmra.mxu0 %v429_v38  ;;  %1168 = vmatprep.subr.mxu0 %v1529_v15 }
  0xc1   : > { %1169 = vmatpush3.msra.mxu0 %v1529_v15  ;;  %1176 = vmatprep.mubr.msk.f32.mxu0 %vm313_vm0, %v1071_v31  ;;  %v1080_v31 = vld [vmem:[%s1668_s4] ss:$0 sm:$0xff] }
  0xc2   : > { %1170 = vmatprep.subr.mxu0 %v1533_v16 }
  0xc3   : > { %1171 = vmatpush3.msra.mxu0 %v1533_v16 }
  0xc4   : > { %1172 = vmatprep.subr.mxu0 %v1536_v17 }
  0xc5   : > { %1173 = vmatpush3.msra.mxu0 %v1536_v17 }
  0xc6   : > { %1174 = vmatprep.subr.mxu0 %v1539_v18 }
  0xc7   : > { %1175 = vmatpush3.msra.mxu0 %v1539_v18 }
  0xc8   : > { %1177 = vmatmul.mubr.msk.f32.vlgmr.msra.gmra.mxu0 %vm313_vm0, %v1072_v35 }
 0x16e   : > { %v1145_v47 = vpop.f32.mrf.mxu1 }
 0x170   : > { %v525_v49 = vpop.f32.mrf.mxu1 }
 0x176   : > { %v1167_v52 = vpop.f32.mrf.mxu1 }
 0x178   : > { %v1134_v46 = vpop.f32.mrf.mxu0  ;;  %v695_v57 = vpop.f32.mrf.mxu1 }
 0x179   : > { %v532_v51 = vadd.f32 %v1145_v47, %v1134_v46 }
 0x17a   : > { %v424_v48 = vpop.f32.mrf.mxu0 }
 0x17b   : > { %v526_v54 = vadd.f32 %v525_v49, %v424_v48 }
 0x17f   : > { %v1189_v59 = vpop.f32.mrf.mxu1 }
 0x180   : > { %v1156_v50 = vpop.f32.mrf.mxu0 }
 0x181   : > { %v619_v55 = vadd.f32 %v1156_v50, %v532_v51  ;;  %v867_v3 = vpop.f32.mrf.mxu1 }
 0x182   : > { %v611_v53 = vpop.f32.mrf.mxu0 }
 0x183   : > { %v612_v56 = vadd.f32 %v611_v53, %v526_v54  ;;  %v704_v58 = vadd.f32 %v1167_v52, %v619_v55 }
 0x185   : > { %v696_v62 = vadd.f32 %v695_v57, %v612_v56 }
 0x188   : > { %v1178_v60 = vpop.f32.mrf.mxu0 }
 0x189   : > { %v793_v61 = vadd.f32 %v1178_v60, %v704_v58 }
 0x18a   : > { %v786_v0 = vpop.f32.mrf.mxu0 }
 0x18b   : > { %v874_v1 = vadd.f32 %v1189_v59, %v793_v61  ;;  %v787_v2 = vadd.f32 %v786_v0, %v696_v62 }
 0x18d   : > { %v878_v5 = vadd.f32 %v874_v1, %v337_v63  ;;  %v868_v6 = vadd.f32 %v867_v3, %v787_v2 }
 0x18f   : > { %880 = vst.msk [vmem:[#allocation2 + $0x8] sm:$0xff] %vm313_vm0, %v878_v5  ;;  %v877_v7 = vadd.f32 %v868_v6, %v336_v4 }
 0x191   : > { %879 = vst.msk [vmem:[#allocation2] sm:$0xff] %vm313_vm0, %v877_v7 }
 0x196   : > { %v885_v10 = vld [vmem:[#allocation2 + $0x8] sm:$0xff] }
 0x197   : > { %v889_v11 = vsel %vm313_vm0, %v885_v10, 0.0 }
 0x198   : > { %v884_v8 = vld [vmem:[#allocation2] sm:$0xff] }
 0x199   : > { %v886_v9 = vsel %vm313_vm0, %v884_v8, 0.0 }
 0x19a   : > { %887 = vadd.xlane.f32.xlu1 %v886_v9 }
 0x19e   : > { %890 = vadd.xlane.f32.xlu1 %v889_v11 }
 0x223   : > { %v888_v12 = vpop.xlane.xlu1 %887 }
 0x224   : > { %v893_v13 = vmul.f32 0.03125, %v888_v12 }
 0x226   : > { %v895_v14 = vsub.f32 %v884_v8, %v893_v13 }
 0x227   : > { %v891_v15 = vpop.xlane.xlu1 %890 }
 0x228   : > { %v894_v16 = vmul.f32 0.03125, %v891_v15  ;;  %v897_v17 = vmul.f32 %v895_v14, %v895_v14 }
 0x22a   : > { %v896_v18 = vsub.f32 %v885_v10, %v894_v16  ;;  %v899_v19 = vsel %vm313_vm0, %v897_v17, 0.0 }
 0x22b   : > { %900 = vadd.xlane.f32.xlu0 %v899_v19 }
 0x22c   : > { %v898_v20 = vmul.f32 %v896_v18, %v896_v18 }
 0x22e   : > { %v902_v21 = vsel %vm313_vm0, %v898_v20, 0.0 }
 0x22f   : > { %903 = vadd.xlane.f32.xlu1 %v902_v21 }
 0x2b4   : > { %v901_v22 = vpop.xlane.xlu0 %900 }
 0x2b5   : > { %v905_v23 = vmul.f32 0.03125, %v901_v22 }
 0x2b7   : > { %v907_v24 = vadd.f32 1e-12, %v905_v23 }
 0x2b8   : > { %v904_v25 = vpop.xlane.xlu1 %903 }
 0x2b9   : > { %1263 = vrsqrt.f32 %v907_v24  ;;  %v906_v26 = vmul.f32 0.03125, %v904_v25 }
 0x2bb   : > { %v908_v27 = vadd.f32 1e-12, %v906_v26 }
 0x2bd   : > { %1265 = vrsqrt.f32 %v908_v27 }
 0x2c6   : > { %v1264_v28 = vpop.eup %1263 }
 0x2c7   : > { %v911_v30 = vmul.f32 %v1264_v28, %v895_v14 }
 0x2c9   : > { %v920_v32 = vmul.f32 %v1079_v29, %v911_v30 }
 0x2ca   : > { %v1266_v33 = vpop.eup %1265 }
 0x2cb   : > { %v929_v34 = vadd.f32 %v1080_v31, %v920_v32  ;;  %v912_v35 = vmul.f32 %v1266_v33, %v896_v18 }
 0x2cd   : > { %v921_v36 = vmul.f32 %v1079_v29, %v912_v35  ;;  %931 = vst.msk [vmem:[%s288_s29] sm:$0xff] %vm313_vm0, %v929_v34 }
 0x2cf   : > { %v930_v37 = vadd.f32 %v1080_v31, %v921_v36 }
 0x2d1   : > { %932 = vst.msk [vmem:[%s288_s29 + $0x8] sm:$0xff] %vm313_vm0, %v930_v37 }
 0x2d2   : > { %1306 = shalt.err (!%p1303_p3)
}
 0x2d3   : > { %s1307_s14 = scalar_lea.hbm %s1614_s10, 256  ;;  %s1311_s24 = scalar_lea.hbm %s1669_s5, 512 }
 0x2d4   : > { %p1308_p5 = scmp.ne.s32.totalorder %s1614_s10, %s1307_s14  ;;  %p1312_p9 = scmp.lt.s32.totalorder %s1614_s10, %s1669_s5 }
 0x2d5   : > { %p1313_p12 = scmp.lt.s32.totalorder %s1311_s24, %s1307_s14 }
 0x2d6   : > { %p1309_p6 = pnand %p1308_p5, %p1453_p4 }
 0x2d7   : > { %p1314_p10 = por %p1313_p12, %p1312_p9 }
 0x2d8   : > { %p1310_p7 = pneg %p1309_p6 }
 0x2da   : > { %p1315_p11 = pnand %p1314_p10, %p1310_p7 }
 0x2dc   : > { %1318 = shalt.err (!%p1315_p11)
}
 0x2dd   : > { %s1381_s29 = smov 128   ;;  %s1382_s8 = smov 8  }
 0x2de   : > { %1194 = dma.vmem_to_hbm [thread:$0]  (%p1453_p4), %s1616_s7, 256, %s1614_s10, %s1619_s11, %s1381_s29, %s1381_s29, %s1382_s8  }
 0x2df PF: > { %p1206_p13 = scmp.ge.s32.totalorder %s1373_s23, 2  ;;  %s964_s9 = sand.u32 1, %s1353_s18  }
 0x2e0   : > { %s965_s21 = scalar_lea.sflag [#allocation5], %s964_s9 }
 0x2e1   : > { %p1201_p0 = pnand %p1206_p13, %p1460_p8 }
 0x2e3   : > { %p1202_p1 = pneg %p1201_p0 }
 0x2e5   : > { %1348 = dma.done.wait (%p1202_p1), %s965_s21, 256  }
 0x2e6   : > { %1350 = vsyncadd (%p1202_p1), %s965_s21, 4294967040  ;;  %s19_s23 = sadd.s32 1, %s1373_s23   ;;  %s1674_s18 = smov %s1357_s19 }
 0x2e7   : > { %p16_p2 = scmp.ge.s32.totalorder %s19_s23, 4   ;;  %s1675_s19 = smov %s1361_s20 }
 0x2e8   : > { %s1676_s20 = smov %s1466_s6  ;;  %s1677_s21 = smov %s1369_s22 }
 0x2e9   : > { %s1678_s22 = smov %s1680_s26  ;;  %18 = sbr.rel (!%p16_p2) target bundleno = 5 (0x5), region = 92 }
 0x2ee   :  { %970 = vsyncpa [#allocation4], 1 }
 0x2ef   :  { %972 = vsyncpa [#allocation4 + $0x1], 1 }
 0x2f0   :  { %973 = vsyncpa [#allocation5], 1 }
 0x2f1   :  { %975 = vsyncpa [#allocation5 + $0x1], 1 }

</bundles_post_ra>
